<compile_context>
chip_gen: v7x
topology: tpu7x:2x2x1
jax: 0.10.0
libtpu: 0.0.40
codegen_flags: <defaults>
</compile_context>

<pallas_src>
import jax
import jax.numpy as jnp
from jax.experimental import pallas as pl
from jax.experimental.pallas import tpu as pltpu


def _round_up(n: int, m: int) -> int:
    return ((n + m - 1) // m) * m


# --------------------------------------------------------------------------
# One-time (init-time) parameter packing
# --------------------------------------------------------------------------
def pack_rk_pinn_params(params, dtype=jnp.float32):
    """Pack all nn.Linear weights/biases into ONE contiguous 128-lane slab.

    Call ONCE at model init (not per forward).  Layout: for each layer
    (W: (out, in), b: (out,)) a round_up(out, 8)-row block whose columns
    [0:in) hold W and column `in` holds b (bias as an extra column, i.e.
    feature-major, so it broadcasts over the 128-lane batch axis in-kernel).

    Returns (slab, meta) where meta carries static slice offsets.
    """
    col_need = max(w.shape[1] + 1 for (w, _) in params)
    ncols = _round_up(col_need, 128)

    blocks, layers, row = [], [], 0
    for (w, b) in params:
        out_f, in_f = w.shape
        out_pad = _round_up(out_f, 8)
        blk = jnp.zeros((out_pad, ncols), dtype)
        blk = blk.at[:out_f, :in_f].set(w.astype(dtype))
        blk = blk.at[:out_f, in_f].set(b.astype(dtype))
        blocks.append(blk)
        layers.append((row, out_f, in_f))
        row += out_pad

    slab = jnp.concatenate(blocks, axis=0)
    meta = {
        "layers": tuple(layers),                      # (row_start, out, in) per layer
        "in_dim": int(params[0][0].shape[1]),
        "out_dim": int(params[-1][0].shape[0]),
    }
    return slab, meta


# --------------------------------------------------------------------------
# Kernel
# --------------------------------------------------------------------------
def make_pinn_kernel(layer_meta, mm_dtype):
    """RK_PINN forward on one batch tile.

    x arrives batch-major (tile_b, in_dim); activations are carried
    feature-major (features, tile_b) so the batch sits on the 128-lane axis —
    every vreg feeding the EUP (tanh, the binding unit) and the output store
    stay lane-dense.  The batch-major -> feature-major transpose is folded
    into layer 1 as an NT contraction (contract x's last dim with W1's last
    dim), so no wrapper-side transpose of x is needed.
    """
    *hidden_meta, out_meta = layer_meta

    def kernel(x_ref, p_ref, o_ref):
        x = x_ref[...].astype(mm_dtype)                        # (tile_b, in)

        # Layer 1: (hidden, in) x (tile_b, in) contracting last dims -> (hidden, tile_b)
        r, o, i = hidden_meta[0]
        w = p_ref[r:r + o, 0:i]
        b = p_ref[r:r + o, i:i + 1].astype(jnp.float32)        # (hidden, 1)
        h = jnp.tanh(
            jax.lax.dot_general(w, x, (((1,), (1,)), ((), ())),
                                preferred_element_type=jnp.float32) + b)

        # Remaining hidden layers: h = tanh(W @ h + b), feature-major.
        for (r, o, i) in hidden_meta[1:]:
            w = p_ref[r:r + o, 0:i]
            b = p_ref[r:r + o, i:i + 1].astype(jnp.float32)
            h = jnp.tanh(
                jnp.dot(w, h.astype(mm_dtype),
                        preferred_element_type=jnp.float32) + b)

        # Output layer: (out, hidden) @ (hidden, tile_b) -> (out, tile_b).
        r, o, i = out_meta
        wo = p_ref[r:r + o, 0:i]
        bo = p_ref[r:r + o, i:i + 1].astype(jnp.float32)
        y = jnp.dot(wo, h.astype(mm_dtype),
                    preferred_element_type=jnp.float32) + bo
        o_ref[...] = y.astype(o_ref.dtype)                     # lane-dense store

    return kernel


# --------------------------------------------------------------------------
# Wrapper
# --------------------------------------------------------------------------
def rk_pinn_forward(x, slab, meta, *, tile_b=None):
    """Forward pass matching RK_PINN.

    x: (batch, input_dim) float32, batch-major (no wrapper transpose/pad of x).
    slab, meta: from pack_rk_pinn_params (built once at init).
    tile_b: batch tile.  Default = two lane-dense tiles so both v7x TCs get
            work; on single-TC v5e/v6e pass _round_up(batch, 256) (grid of 1).
    """
    batch, in_dim = x.shape
    assert in_dim == meta["in_dim"], "input dim mismatch with packed params"
    out_dim = meta["out_dim"]
    nrows, ncols = slab.shape

    if tile_b is None:
        tile_b = max(256, min(2048, _round_up(-(-batch // 2), 256)))
    batch_pad = _round_up(batch, tile_b)
    xp = x if batch_pad == batch else jnp.pad(x, ((0, batch_pad - batch), (0, 0)))
    grid = (batch_pad // tile_b,)

    kernel = make_pinn_kernel(meta["layers"], slab.dtype)

    # x: tiled along the batch (sublane) axis; block last dim = full in_dim.
    x_spec = pl.BlockSpec((tile_b, in_dim), lambda i: (i, 0))
    # Output is feature-major (out_dim, batch) so the in-kernel store keeps the
    # batch on the 128-lane axis (lane-dense vst); transposed back below.
    out_spec = pl.BlockSpec((out_dim, tile_b), lambda i: (0, i))

    # Advisory cost estimate (true, unpadded-ish work).
    flops = sum(2 * batch_pad * o * i for (_, o, i) in meta["layers"])
    transcendentals = batch_pad * sum(o for (_, o, _) in meta["layers"][:-1])
    bytes_accessed = (4 * batch_pad * (in_dim + out_dim)
                      + slab.size * slab.dtype.itemsize)

    def call(single_buffer_params: bool):
        if single_buffer_params:
            # Constant index_map -> slab is resident across the whole grid;
            # a second pipeline buffer would be pure VMEM/bookkeeping waste.
            p_spec = pl.BlockSpec((nrows, ncols), lambda i: (0, 0),
                                  pipeline_mode=pl.Buffered(1))
        else:
            p_spec = pl.BlockSpec((nrows, ncols), lambda i: (0, 0))
        return pl.pallas_call(
            kernel,
            out_shape=jax.ShapeDtypeStruct((out_dim, batch_pad), jnp.float32),
            grid_spec=pltpu.PrefetchScalarGridSpec(
                num_scalar_prefetch=0,
                grid=grid,
                in_specs=[x_spec, p_spec],
                out_specs=out_spec,
            ),
            compiler_params=pltpu.CompilerParams(
                dimension_semantics=("parallel",),
            ),
            cost_estimate=pl.CostEstimate(
                flops=flops,
                transcendentals=transcendentals,
                bytes_accessed=bytes_accessed,
            ),
        )(xp, slab)

    try:
        yT = call(True)
        yT.block_until_ready()
    except Exception:
        # Portability guard: older jax without pipeline_mode / Buffered(1)
        # support for grid-invariant blocks falls back to default buffering.
        yT = call(False)

    y = yT.T                                  # tiny (out_dim x batch) transpose
    return y if batch_pad == batch else y[:batch]


# --------------------------------------------------------------------------
# Init + pure-JAX reference (PyTorch semantics)
# --------------------------------------------------------------------------
def init_rk_pinn_params(key, input_dim, hidden_dim, output_dim, num_layers=2):
    """Deterministic init mirroring nn.Linear: W (out, in), b (out,)."""
    dims = [(input_dim, hidden_dim)]
    for _ in range(num_layers - 1):
        dims.append((hidden_dim, hidden_dim))
    dims.append((hidden_dim, output_dim))  # output layer

    params = []
    for (fan_in, fan_out) in dims:
        key, kw, kb = jax.random.split(key, 3)
        bound = 1.0 / jnp.sqrt(fan_in)
        w = jax.random.uniform(kw, (fan_out, fan_in), jnp.float32,
                               minval=-bound, maxval=bound)
        b = jax.random.uniform(kb, (fan_out,), jnp.float32,
                               minval=-bound, maxval=bound)
        params.append((w, b))
    return params


def rk_pinn_reference(x, params):
    """Pure-JAX reference (PyTorch semantics: y = x @ W.T + b)."""
    h = x
    for (w, b) in params[:-1]:
        h = jnp.tanh(h @ w.T + b)
    wo, bo = params[-1]
    return h @ wo.T + bo


if __name__ == "__main__":
    # Shapes consistent with the module: input_dim=4, hidden_dim=32,
    # output_dim=2, num_layers=2.  batch=512 -> default tile_b=256, grid=2
    # (keeps both v7x TensorCores busy; near-optimal on v5e/v6e too).
    input_dim, hidden_dim, output_dim, num_layers = 4, 32, 2, 2
    batch = 512

    key = jax.random.PRNGKey(0)
    key, kx = jax.random.split(key)
    x = jax.random.normal(kx, (batch, input_dim), dtype=jnp.float32)

    params = init_rk_pinn_params(key, input_dim, hidden_dim, output_dim,
                                 num_layers=num_layers)

    # Hoisted out of the per-call path: pack/pad parameters ONCE at init.
    slab, meta = pack_rk_pinn_params(params)          # dtype=jnp.bfloat16 optional on v6e/v7x
    slab = jax.block_until_ready(slab)

    y = rk_pinn_forward(x, slab, meta)
    y = jax.block_until_ready(y)

    y_ref = rk_pinn_reference(x, params)
    assert y.shape == (batch, output_dim)
    max_err = float(jnp.max(jnp.abs(y - y_ref)))
    assert jnp.allclose(y, y_ref, atol=1e-5, rtol=1e-5), f"max abs err = {max_err}"

    print("KERNEL_OK")
</pallas_src>

<mosaic_0001>
module attributes {stable_mosaic.version = 11 : i64} {
  func.func @kernel(%arg0: i32, %arg1: memref<256x4xf32, #tpu.memory_space<vmem>>, %arg2: memref<72x128xf32, #tpu.memory_space<vmem>>, %arg3: memref<2x256xf32, #tpu.memory_space<vmem>>) attributes {dimension_semantics = [#tpu.dimension_semantics<parallel>], iteration_bounds = array<i64: 2>, scalar_prefetch = 0 : i64, scratch_operands = 0 : i64, tpu.core_type = #tpu.core_type<tc>, window_params = [{transform_indices = @transform_0, window_bounds = array<i64: 256, 4>}, {pipeline_mode = #tpu.pipeline_mode<synchronous>, transform_indices = @transform_1, window_bounds = array<i64: 72, 128>}, {transform_indices = @transform_2, window_bounds = array<i64: 2, 256>}]} {
    %c0 = arith.constant 0 : index
    %c0_0 = arith.constant 0 : index
    %0 = vector.load %arg1[%c0, %c0_0] : memref<256x4xf32, #tpu.memory_space<vmem>>, vector<256x4xf32>
    %c0_1 = arith.constant 0 : index
    %c0_2 = arith.constant 0 : index
    %1 = vector.load %arg2[%c0_1, %c0_2] : memref<72x128xf32, #tpu.memory_space<vmem>>, vector<32x4xf32>
    %c0_3 = arith.constant 0 : index
    %c4 = arith.constant 4 : index
    %2 = vector.load %arg2[%c0_3, %c4] : memref<72x128xf32, #tpu.memory_space<vmem>>, vector<32x1xf32>
    %cst = arith.constant dense<0.000000e+00> : vector<32x256xf32>
    %3 = tpu.matmul %1, %0, %cst {dimension_numbers = #tpu.dot_dimension_numbers<[1], [1], [0], [0], [0, 0, 1, 0], [], []>} : vector<32x4xf32>, vector<256x4xf32>, vector<32x256xf32> -> vector<32x256xf32>
    %4 = vector.broadcast %2 : vector<32x1xf32> to vector<32x256xf32>
    %5 = arith.addf %3, %4 : vector<32x256xf32>
    %6 = math.tanh %5 : vector<32x256xf32>
    %c32 = arith.constant 32 : index
    %c0_4 = arith.constant 0 : index
    %7 = vector.load %arg2[%c32, %c0_4] : memref<72x128xf32, #tpu.memory_space<vmem>>, vector<32x32xf32>
    %c32_5 = arith.constant 32 : index
    %c32_6 = arith.constant 32 : index
    %8 = vector.load %arg2[%c32_5, %c32_6] : memref<72x128xf32, #tpu.memory_space<vmem>>, vector<32x1xf32>
    %cst_7 = arith.constant dense<0.000000e+00> : vector<32x256xf32>
    %9 = tpu.matmul %7, %6, %cst_7 {dimension_numbers = #tpu.dot_dimension_numbers<[1], [0], [0], [1], [0, 0, 1, 1], [], []>} : vector<32x32xf32>, vector<32x256xf32>, vector<32x256xf32> -> vector<32x256xf32>
    %10 = vector.broadcast %8 : vector<32x1xf32> to vector<32x256xf32>
    %11 = arith.addf %9, %10 : vector<32x256xf32>
    %12 = math.tanh %11 : vector<32x256xf32>
    %c64 = arith.constant 64 : index
    %c0_8 = arith.constant 0 : index
    %13 = vector.load %arg2[%c64, %c0_8] : memref<72x128xf32, #tpu.memory_space<vmem>>, vector<2x32xf32>
    %c64_9 = arith.constant 64 : index
    %c32_10 = arith.constant 32 : index
    %14 = vector.load %arg2[%c64_9, %c32_10] : memref<72x128xf32, #tpu.memory_space<vmem>>, vector<2x1xf32>
    %cst_11 = arith.constant dense<0.000000e+00> : vector<2x256xf32>
    %15 = tpu.matmul %13, %12, %cst_11 {dimension_numbers = #tpu.dot_dimension_numbers<[1], [0], [0], [1], [0, 0, 1, 1], [], []>} : vector<2x32xf32>, vector<32x256xf32>, vector<2x256xf32> -> vector<2x256xf32>
    %16 = vector.broadcast %14 : vector<2x1xf32> to vector<2x256xf32>
    %17 = arith.addf %15, %16 : vector<2x256xf32>
    %c0_12 = arith.constant 0 : index
    %c0_13 = arith.constant 0 : index
    %18 = vector.load %arg3[%c0_12, %c0_13] : memref<2x256xf32, #tpu.memory_space<vmem>>, vector<2x256xf32>
    tpu.vector_store %arg3[%c0_12, %c0_13], %17 {strides = array<i32>} : memref<2x256xf32, #tpu.memory_space<vmem>>, vector<2x256xf32>,
    return
  }
  func.func @transform_0(%arg0: i32) -> (i32, i32) {
    %c0_i32 = arith.constant 0 : i32
    %c0_i32_0 = arith.constant 0 : i32
    return %arg0, %c0_i32 : i32, i32
  }
  func.func @transform_1(%arg0: i32) -> (i32, i32) {
    %c0_i32 = arith.constant 0 : i32
    %c0_i32_0 = arith.constant 0 : i32
    %c0_i32_1 = arith.constant 0 : i32
    return %c0_i32, %c0_i32_0 : i32, i32
  }
  func.func @transform_2(%arg0: i32) -> (i32, i32) {
    %c0_i32 = arith.constant 0 : i32
    %c0_i32_0 = arith.constant 0 : i32
    return %c0_i32, %arg0 : i32, i32
  }
}

module attributes {stable_mosaic.version = 11 : i64} {
  func.func @kernel(%arg0: i32, %arg1: memref<256x4xf32, #tpu.memory_space<vmem>>, %arg2: memref<72x128xf32, #tpu.memory_space<vmem>>, %arg3: memref<2x256xf32, #tpu.memory_space<vmem>>) attributes {dimension_semantics = [#tpu.dimension_semantics<parallel>], iteration_bounds = array<i64: 2>, scalar_prefetch = 0 : i64, scratch_operands = 0 : i64, tpu.core_type = #tpu.core_type<tc>, window_params = [{transform_indices = @transform_0, window_bounds = array<i64: 256, 4>}, {pipeline_mode = #tpu.pipeline_mode<synchronous>, transform_indices = @transform_1, window_bounds = array<i64: 72, 128>}, {transform_indices = @transform_2, window_bounds = array<i64: 2, 256>}]} {
    %c0 = arith.constant 0 : index
    %c0_0 = arith.constant 0 : index
    %0 = vector.load %arg1[%c0, %c0_0] : memref<256x4xf32, #tpu.memory_space<vmem>>, vector<256x4xf32>
    %c0_1 = arith.constant 0 : index
    %c0_2 = arith.constant 0 : index
    %1 = vector.load %arg2[%c0_1, %c0_2] : memref<72x128xf32, #tpu.memory_space<vmem>>, vector<32x4xf32>
    %c0_3 = arith.constant 0 : index
    %c4 = arith.constant 4 : index
    %2 = vector.load %arg2[%c0_3, %c4] : memref<72x128xf32, #tpu.memory_space<vmem>>, vector<32x1xf32>
    %cst = arith.constant dense<0.000000e+00> : vector<32x256xf32>
    %3 = tpu.matmul %1, %0, %cst {dimension_numbers = #tpu.dot_dimension_numbers<[1], [1], [0], [0], [0, 0, 1, 0], [], []>} : vector<32x4xf32>, vector<256x4xf32>, vector<32x256xf32> -> vector<32x256xf32>
    %4 = vector.broadcast %2 : vector<32x1xf32> to vector<32x256xf32>
    %5 = arith.addf %3, %4 : vector<32x256xf32>
    %6 = math.tanh %5 : vector<32x256xf32>
    %c32 = arith.constant 32 : index
    %c0_4 = arith.constant 0 : index
    %7 = vector.load %arg2[%c32, %c0_4] : memref<72x128xf32, #tpu.memory_space<vmem>>, vector<32x32xf32>
    %c32_5 = arith.constant 32 : index
    %c32_6 = arith.constant 32 : index
    %8 = vector.load %arg2[%c32_5, %c32_6] : memref<72x128xf32, #tpu.memory_space<vmem>>, vector<32x1xf32>
    %cst_7 = arith.constant dense<0.000000e+00> : vector<32x256xf32>
    %9 = tpu.matmul %7, %6, %cst_7 {dimension_numbers = #tpu.dot_dimension_numbers<[1], [0], [0], [1], [0, 0, 1, 1], [], []>} : vector<32x32xf32>, vector<32x256xf32>, vector<32x256xf32> -> vector<32x256xf32>
    %10 = vector.broadcast %8 : vector<32x1xf32> to vector<32x256xf32>
    %11 = arith.addf %9, %10 : vector<32x256xf32>
    %12 = math.tanh %11 : vector<32x256xf32>
    %c64 = arith.constant 64 : index
    %c0_8 = arith.constant 0 : index
    %13 = vector.load %arg2[%c64, %c0_8] : memref<72x128xf32, #tpu.memory_space<vmem>>, vector<2x32xf32>
    %c64_9 = arith.constant 64 : index
    %c32_10 = arith.constant 32 : index
    %14 = vector.load %arg2[%c64_9, %c32_10] : memref<72x128xf32, #tpu.memory_space<vmem>>, vector<2x1xf32>
    %cst_11 = arith.constant dense<0.000000e+00> : vector<2x256xf32>
    %15 = tpu.matmul %13, %12, %cst_11 {dimension_numbers = #tpu.dot_dimension_numbers<[1], [0], [0], [1], [0, 0, 1, 1], [], []>} : vector<2x32xf32>, vector<32x256xf32>, vector<2x256xf32> -> vector<2x256xf32>
    %16 = vector.broadcast %14 : vector<2x1xf32> to vector<2x256xf32>
    %17 = arith.addf %15, %16 : vector<2x256xf32>
    %c0_12 = arith.constant 0 : index
    %c0_13 = arith.constant 0 : index
    %18 = vector.load %arg3[%c0_12, %c0_13] : memref<2x256xf32, #tpu.memory_space<vmem>>, vector<2x256xf32>
    tpu.vector_store %arg3[%c0_12, %c0_13], %17 {strides = array<i32>} : memref<2x256xf32, #tpu.memory_space<vmem>>, vector<2x256xf32>,
    return
  }
  func.func @transform_0(%arg0: i32) -> (i32, i32) {
    %c0_i32 = arith.constant 0 : i32
    %c0_i32_0 = arith.constant 0 : i32
    return %arg0, %c0_i32 : i32, i32
  }
  func.func @transform_1(%arg0: i32) -> (i32, i32) {
    %c0_i32 = arith.constant 0 : i32
    %c0_i32_0 = arith.constant 0 : i32
    %c0_i32_1 = arith.constant 0 : i32
    return %c0_i32, %c0_i32_0 : i32, i32
  }
  func.func @transform_2(%arg0: i32) -> (i32, i32) {
    %c0_i32 = arith.constant 0 : i32
    %c0_i32_0 = arith.constant 0 : i32
    return %c0_i32, %arg0 : i32, i32
  }
}

</mosaic_0001>

<bundles_post_ra>
// kernel: tpu_custom_call.1
= control target key start
LH: loop header
LB: loop body
LE: loop exit
PB: predicated region body
PF: predicated region fallthrough
CT: control target
= control target key end

     0   :  { %7 = vsyncpa [#allocation3], 0  ;;  %s1258_s0 = inlined_call_operand.vmem [shape: f32[512,4], index: 0, kind: input, shape index: {}]   ;;  %s1259_s1 = inlined_call_operand.vmem [shape: f32[72,128], index: 1, kind: input, shape index: {}]   ;;  %s1260_s2 = inlined_call_operand.hbm [shape: f32[2,512], index: 2, kind: output, shape index: {}]  }
   0x1   :  { %9 = vsyncpa [#allocation3 + $0x1], 0  ;;  %s1018_s9 = smov 0   ;;  %s1020_s10 = smov 0  }
   0x2   :  { %s1022_s11 = smov 0   ;;  %s1024_s12 = smov 0  }
   0x3 LB: > { %s1039_s13 = sadd.s32 4294967295, %s997_s12   ;;  %s698_s14 = sadd.s32 4294967294, %s997_s12   ;;  %s997_s12 = sphi %s1024_s12, %s1268_s12   ;;  %s993_s11 = sphi %s1022_s11, %s1267_s11   ;;  %s989_s10 = sphi %s1020_s10, %s1266_s10   ;;  %s985_s9 = sphi %s1018_s9, %s1265_s9  }
   0x4   : > { %s1043_s15 = sadd.s32 1, %s997_s12   ;;  %s69_s16 = sadd.s32 1, %s993_s11 }
   0x5   : > { %s66_s17 = ssub.s32 %s997_s12, %s1043_s15  ;;  %p79_p0 = scmp.ne.s32.totalorder %s993_s11, %s989_s10 }
   0x6   : > { %p67_p1 = scmp.eq.s32.totalorder %s66_s17, 0  ;;  %p80_p2 = scmp.eq.s32.totalorder %s1039_s13, 1 }
   0x7   : > { %p85_p3 = scmp.ne.s32.totalorder %s989_s10, %s985_s9  ;;  %p86_p4 = scmp.eq.s32.totalorder %s698_s14, 1 }
   0x8   : > { %s1054_s18 = scalar_select %p67_p1, %s993_s11, %s69_s16  }
   0x9   : > { %p1056_p5 = por %p80_p2, %p79_p0  ;;  %p1060_p6 = por %p86_p4, %p85_p3 }
   0xa   : > { %p701_p7 = scmp.ge.s32.totalorder %s997_s12, 1  ;;  %p116_p8 = scmp.lt.s32.totalorder %s997_s12, 3 }
   0xc   : > { %p117_p9 = pnand %p701_p7, %p116_p8 }
   0xd   : > { %s703_s21 = sshll.u32 (!%p117_p9), %s1039_s13, 5  ;;  %vm201_vm0 = vcmask (!%p117_p9), 31744   ;;  %v1070_v0 = vld [vmem:[%s1259_s1] sm:$0xff] (!%p117_p9)  ;;  %v999_v1 = vmov (!%p117_p9), 4   ;;  %v1077_v2 = vld [vmem:[%s1259_s1 + $0x10] sm:$0xff] (!%p117_p9)  ;;  %v1084_v3 = vld [vmem:[%s1259_s1 + $0x8] sm:$0xff] (!%p117_p9) }
   0xe   : > { %120 = sbr.rel (%p117_p9) target bundleno = 810 (0x32a), region = 28  ;;  %p139_p10 = scmp.lt.s32.totalorder (!%p117_p9), %s703_s21, 63  ;;  %785 = vmatprep.mubr.msk.f32.mxu0 (!%p117_p9), %vm201_vm0, %v1070_v0  ;;  %899 = vset.pattern.permute.xlu0 (!%p117_p9), %v999_v1  ;;  %vm1093_vm1 = vmpackc.low (!%p117_p9), %vm201_vm0, %vm201_vm0  ;;  %v1100_v5 = vld [vmem:[%s1259_s1 + $0x18] sm:$0xff] (!%p117_p9)  ;;  %v1000_v54 = vmov (!%p117_p9), 0.0   ;;  %v403_v55 = vld [vmem:[%s1259_s1 + $0x20] sm:$0xff] (!%p117_p9)  ;;  %v1001_v57 = vmov (!%p117_p9), 32  }
   0xf   : > { %183 = vperm.xlu0 (!%p117_p9), %899, %v1070_v0   ;;  %900 = vset.pattern.permute.xlu1 (!%p117_p9), %v999_v1  ;;  %v404_v56 = vld [vmem:[%s1259_s1 + $0x28] sm:$0xff] (!%p117_p9)  ;;  %v405_v58 = vld [vmem:[%s1259_s1 + $0x30] sm:$0xff] (!%p117_p9)  ;;  %v406_v59 = vld [vmem:[%s1259_s1 + $0x38] sm:$0xff] (!%p117_p9)  ;;  %vm427_vm2 = vcmask (!%p117_p9), 261120   ;;  %s135_s25 = sand.u32 (!%p117_p9), 1, %s989_s10   ;;  %s752_s27 = sshll.u32 (!%p117_p9), %s1039_s13, 6 }
  0x10   : > { %193 = vperm.xlu1 (!%p117_p9), %900, %v1077_v2   ;;  %500 = vmatprep.mubr.f32.mxu1 (!%p117_p9), %v1000_v54  ;;  %v1198_v60 = vld [vmem:[%s1259_s1 + $0x40] sm:$0x3] (!%p117_p9)  ;;  %s1216_s4 = scalar_lea.hbm (!%p117_p9), %s1260_s2, %s752_s27  ;;  %s625_s5 = scalar_lea.sflag (!%p117_p9), [#allocation3], %s135_s25 }
  0x11   : > { %s1002_s13 = smov (!%p117_p9), [#allocation2]  }
  0x12   : > { %s939_s7 = sshll.u32 (!%p117_p9), %s1002_s13, 4  ;;  %s940_s7 = int_to_ptr.vmem [resolvable:$false] %s939_s7 }
  0x13   : > { %188 = vperm.xlu0 (!%p117_p9), %899, %v1084_v3   ;;  %s941_s8 = scalar_lea.vmem (!%p117_p9), %s940_s7, 128 }
  0x14   : > { %198 = vperm.xlu1 (!%p117_p9), %900, %v1100_v5  }
  0x15   : > { %s1270_s21 = smov (!%p139_p10, %s703_s21), 63 }
  0x16   : > { %s704_s26 = sshll.u32 %s1270_s21, 3 }
  0x17   : > { %s1089_s3 = scalar_lea.vmem %s1258_s0, %s704_s26  ;;  %901 = vset.pattern.permute.xlu0 %v1001_v57  ;;  %s702_s26 = sshll.u32 %s135_s25, 2 }
  0x18   : > { %v161_v6 = vld [vmem:[%s1089_s3 + $0x80] sm:$0xff]  ;;  %v162_v7 = vld [vmem:[%s1089_s3 + $0x88] sm:$0xff]  ;;  %v163_v11 = vld [vmem:[%s1089_s3 + $0x90] sm:$0xff]  ;;  %902 = vset.pattern.permute.xlu1 %v1001_v57  ;;  %409 = vperm.xlu0 %901, %v403_v55   ;;  %s137_s28 = scalar_lea.vmem [#allocation2], %s702_s26 }
  0x19   : > { %v145_v8 = vld [vmem:[%s1089_s3] sm:$0xff]  ;;  %v793_v9 = vpack.c.bf16 %v162_v7, %v161_v6  ;;  %v146_v10 = vld [vmem:[%s1089_s3 + $0x8] sm:$0xff]  ;;  %v164_v12 = vld [vmem:[%s1089_s3 + $0x98] sm:$0xff]  ;;  %414 = vperm.xlu1 %902, %v404_v56   ;;  %s639_s29 = sshll.u32 %s137_s28, 4  ;;  %s1218_s29 = int_to_ptr.vmem [resolvable:$true] %s639_s29 }
  0x1a   : > { %v796_v13 = vpack.c.bf16 %v146_v10, %v145_v8  ;;  %v799_v14 = vpack.c.bf16 %v164_v12, %v163_v11  ;;  %v147_v15 = vld [vmem:[%s1089_s3 + $0x10] sm:$0xff]  ;;  %v148_v16 = vld [vmem:[%s1089_s3 + $0x18] sm:$0xff]  ;;  %v165_v17 = vld [vmem:[%s1089_s3 + $0xa0] sm:$0xff]  ;;  %s935_s6 = scalar_lea.vmem %s1218_s29, 64  ;;  %p942_p0 = scmp.lt.s32.totalorder %s1218_s29, %s940_s7 }
  0x1b   : > { %795 = vmatprep.subr.msk.bf16.mxu0 %vm1093_vm1, %v793_v9  ;;  %v166_v18 = vld [vmem:[%s1089_s3 + $0xa8] sm:$0xff]  ;;  %v802_v19 = vpack.c.bf16 %v148_v16, %v147_v15  ;;  %v149_v21 = vld [vmem:[%s1089_s3 + $0x20] sm:$0xff]  ;;  %v167_v23 = vld [vmem:[%s1089_s3 + $0xb0] sm:$0xff]  ;;  %p936_p11 = scmp.ne.s32.totalorder %s1218_s29, %s935_s6  ;;  %p943_p1 = scmp.lt.s32.totalorder %s941_s8, %s935_s6 }
  0x1c   : > { %798 = vmatpush3.bf16.xpose.msk.msra.mxu0 %vm1093_vm1, %v796_v13  ;;  %v805_v20 = vpack.c.bf16 %v166_v18, %v165_v17  ;;  %v150_v22 = vld [vmem:[%s1089_s3 + $0x28] sm:$0xff]  ;;  %v168_v24 = vld [vmem:[%s1089_s3 + $0xb8] sm:$0xff]  ;;  %v151_v27 = vld [vmem:[%s1089_s3 + $0x30] sm:$0xff]  ;;  %424 = vperm.xlu0 %901, %v406_v59  }
  0x1d   : > { %801 = vmatprep.subr.msk.bf16.mxu0 %vm1093_vm1, %v799_v14  ;;  %v808_v25 = vpack.c.bf16 %v150_v22, %v149_v21  ;;  %v811_v26 = vpack.c.bf16 %v168_v24, %v167_v23  ;;  %v152_v28 = vld [vmem:[%s1089_s3 + $0x38] sm:$0xff]  ;;  %v169_v29 = vld [vmem:[%s1089_s3 + $0xc0] sm:$0xff]  ;;  %v170_v30 = vld [vmem:[%s1089_s3 + $0xc8] sm:$0xff]  ;;  %419 = vperm.xlu1 %902, %v405_v58   ;;  %p937_p12 = pnand %p936_p11, %p1056_p5  ;;  %p944_p2 = por %p943_p1, %p942_p0 }
  0x1e   : > { %v814_v31 = vpack.c.bf16 %v152_v28, %v151_v27  ;;  %v817_v32 = vpack.c.bf16 %v170_v30, %v169_v29  ;;  %v153_v33 = vld [vmem:[%s1089_s3 + $0x40] sm:$0xff]  ;;  %v154_v34 = vld [vmem:[%s1089_s3 + $0x48] sm:$0xff]  ;;  %v171_v35 = vld [vmem:[%s1089_s3 + $0xd0] sm:$0xff] }
  0x1f   : > { %v172_v36 = vld [vmem:[%s1089_s3 + $0xd8] sm:$0xff]  ;;  %v820_v37 = vpack.c.bf16 %v154_v34, %v153_v33  ;;  %v155_v39 = vld [vmem:[%s1089_s3 + $0x50] sm:$0xff]  ;;  %v173_v41 = vld [vmem:[%s1089_s3 + $0xe0] sm:$0xff]  ;;  %p938_p13 = pneg %p937_p12 }
  0x20   : > { %v823_v38 = vpack.c.bf16 %v172_v36, %v171_v35  ;;  %v156_v40 = vld [vmem:[%s1089_s3 + $0x58] sm:$0xff]  ;;  %v174_v42 = vld [vmem:[%s1089_s3 + $0xe8] sm:$0xff]  ;;  %v157_v45 = vld [vmem:[%s1089_s3 + $0x60] sm:$0xff] }
  0x21   : > { %v826_v43 = vpack.c.bf16 %v156_v40, %v155_v39  ;;  %v829_v44 = vpack.c.bf16 %v174_v42, %v173_v41  ;;  %v158_v46 = vld [vmem:[%s1089_s3 + $0x68] sm:$0xff]  ;;  %v175_v47 = vld [vmem:[%s1089_s3 + $0xf0] sm:$0xff]  ;;  %v176_v48 = vld [vmem:[%s1089_s3 + $0xf8] sm:$0xff]  ;;  %536 = vperm.xlu1 %902, %v1198_v60   ;;  %p945_p3 = pnand %p944_p2, %p938_p13 }
  0x22   : > { %v832_v49 = vpack.c.bf16 %v158_v46, %v157_v45  ;;  %v835_v50 = vpack.c.bf16 %v176_v48, %v175_v47  ;;  %v159_v51 = vld [vmem:[%s1089_s3 + $0x70] sm:$0xff]  ;;  %v160_v52 = vld [vmem:[%s1089_s3 + $0x78] sm:$0xff] }
  0x23   : > { %v838_v53 = vpack.c.bf16 %v160_v52, %v159_v51 }
  0x24   : > { %804 = vmatpush3.bf16.xpose.msk.msra.mxu0 %vm1093_vm1, %v802_v19 }
  0x25   : > { %807 = vmatprep.subr.msk.bf16.mxu0 %vm1093_vm1, %v805_v20 }
  0x2c   : > { %810 = vmatpush3.bf16.xpose.msk.msra.mxu0 %vm1093_vm1, %v808_v25 }
  0x2d   : > { %813 = vmatprep.subr.msk.bf16.mxu0 %vm1093_vm1, %v811_v26 }
  0x34   : > { %816 = vmatpush3.bf16.xpose.msk.msra.mxu0 %vm1093_vm1, %v814_v31 }
  0x35   : > { %819 = vmatprep.subr.msk.bf16.mxu0 %vm1093_vm1, %v817_v32 }
  0x3c   : > { %822 = vmatpush3.bf16.xpose.msk.msra.mxu0 %vm1093_vm1, %v820_v37 }
  0x3d   : > { %825 = vmatprep.subr.msk.bf16.mxu0 %vm1093_vm1, %v823_v38 }
  0x44   : > { %828 = vmatpush3.bf16.xpose.msk.msra.mxu0 %vm1093_vm1, %v826_v43 }
  0x45   : > { %831 = vmatprep.subr.msk.bf16.mxu0 %vm1093_vm1, %v829_v44 }
  0x4c   : > { %834 = vmatpush3.bf16.xpose.msk.msra.mxu0 %vm1093_vm1, %v832_v49 }
  0x4d   : > { %837 = vmatprep.subr.msk.bf16.mxu0 %vm1093_vm1, %v835_v50 }
  0x54   : > { %840 = vmatpush3.bf16.xpose.msk.msra.mxu0 %vm1093_vm1, %v838_v53 }
  0x5b   : > { %786 = vmatmul.mubr.msk.f32.vlgmr.msra.gmra.mrb[0].mxu0 %vm201_vm0, %v1070_v0 }
  0x5c   : > { %787 = vmatprep.mubr.msk.f32.mxu0 %vm201_vm0, %v1084_v3 }
  0x5f   : > { %788 = vmatmul.mubr.msk.f32.gmra.mrb[2].mxu0 %vm201_vm0, %v1084_v3 }
  0x60   : > { %789 = vmatprep.mubr.msk.f32.mxu0 %vm201_vm0, %v1077_v2 }
  0x63   : > { %790 = vmatmul.mubr.msk.f32.gmra.mrb[4].mxu0 %vm201_vm0, %v1077_v2 }
  0x64   : > { %791 = vmatprep.mubr.msk.f32.mxu0 %vm201_vm0, %v1100_v5 }
  0x67   : > { %792 = vmatmul.mubr.msk.f32.gmra.mrb[6].mxu0 %vm201_vm0, %v1100_v5 }
  0x8e   : > { %v184_v61 = vpop.permute.xlu0 %183 }
  0x8f   : > { %v194_v6 = vpop.permute.xlu1 %193 }
  0x92   : > { %v189_v2 = vpop.permute.xlu0 %188 }
  0x93   : > { %v199_v12 = vpop.permute.xlu1 %198 }
  0x97   : > { %v410_v29 = vpop.permute.xlu0 %409 }
  0x98   : > { %v415_v33 = vpop.permute.xlu1 %414 }
  0x9b   : > { %v425_v44 = vpop.permute.xlu0 %424 }
  0x9c   : > { %v420_v39 = vpop.permute.xlu1 %419 }
 0x12e   : > { %v372_v62 = vpop.f32.mrb[0].mxu0 }
 0x12f   : > { %v373_v63 = vadd.f32 %v372_v62, %v184_v61  ;;  %v374_v0 = vpop.f32.mrb[1].mxu0  ;;  %v537_v62 = vpop.permute.xlu1 %536 }
 0x130   : > { %v375_v1 = vadd.f32 %v374_v0, %v184_v61 }
 0x131   : > { %903 = vtanh.f32 %v373_v63 }
 0x132   : > { %v378_v3 = vpop.f32.mrb[2].mxu0  ;;  %905 = vtanh.f32 %v375_v1 }
 0x133   : > { %v379_v4 = vadd.f32 %v378_v3, %v189_v2  ;;  %v380_v5 = vpop.f32.mrb[3].mxu0 }
 0x134   : > { %v381_v7 = vadd.f32 %v380_v5, %v189_v2 }
 0x135   : > { %907 = vtanh.f32 %v379_v4 }
 0x136   : > { %909 = vtanh.f32 %v381_v7  ;;  %v384_v8 = vpop.f32.mrb[4].mxu0 }
 0x137   : > { %v385_v9 = vadd.f32 %v384_v8, %v194_v6  ;;  %v386_v10 = vpop.f32.mrb[5].mxu0 }
 0x138   : > { %v387_v11 = vadd.f32 %v386_v10, %v194_v6 }
 0x139   : > { %911 = vtanh.f32 %v385_v9 }
 0x13a   : > { %v390_v13 = vpop.f32.mrb[6].mxu0  ;;  %913 = vtanh.f32 %v387_v11 }
 0x13b   : > { %v391_v14 = vadd.f32 %v390_v13, %v199_v12  ;;  %v392_v15 = vpop.f32.mrb[7].mxu0  ;;  %v904_v17 = vpop.eup %903 }
 0x13c   : > { %v393_v16 = vadd.f32 %v392_v15, %v199_v12  ;;  %v906_v18 = vpop.eup %905 }
 0x13d   : > { %915 = vtanh.f32 %v391_v14 }
 0x13e   : > { %917 = vtanh.f32 %v393_v16 }
 0x13f   : > { %v908_v19 = vpop.eup %907 }
 0x140   : > { %v910_v20 = vpop.eup %909  ;;  %v843_v21 = vpack.c.bf16 %v908_v19, %v904_v17 }
 0x141   : > { %v841_v22 = vpack.c.bf16 %v910_v20, %v906_v18 }
 0x143   : > { %842 = vmatprep.subr.bf16.mxu1 %v841_v22  ;;  %v912_v23 = vpop.eup %911 }
 0x144   : > { %844 = vmatpush1.bf16.msra.mxu1 %v843_v21  ;;  %v914_v24 = vpop.eup %913 }
 0x147   : > { %v916_v25 = vpop.eup %915 }
 0x148   : > { %v918_v26 = vpop.eup %917  ;;  %v847_v27 = vpack.c.bf16 %v916_v25, %v912_v23 }
 0x149   : > { %v845_v28 = vpack.c.bf16 %v918_v26, %v914_v24 }
 0x14b   : > { %846 = vmatprep.subr.bf16.mxu1 %v845_v28 }
 0x14c   : > { %848 = vmatpush1.bf16.msra.mxu1 %v847_v27 }
 0x14f   : > { %741 = vmatmul.mubr.msk.f32.vlgmr.msra.gmra.mrb[0].mxu1 %vm427_vm2, %v403_v55 }
 0x150   : > { %506 = vmatprep.mubr.f32.mxu1 %v1000_v54 }
 0x153   : > { %742 = vmatmul.mubr.msk.f32.gmra.mrb[2].mxu1 %vm427_vm2, %v404_v56 }
 0x154   : > { %512 = vmatprep.mubr.f32.mxu1 %v1000_v54 }
 0x157   : > { %743 = vmatmul.mubr.msk.f32.gmra.mrb[4].mxu1 %vm427_vm2, %v405_v58 }
 0x158   : > { %518 = vmatprep.mubr.f32.mxu1 %v1000_v54 }
 0x15b   : > { %744 = vmatmul.mubr.msk.f32.gmra.mrb[6].mxu1 %vm427_vm2, %v406_v59 }
 0x15c   : > { %605 = vmatprep.mubr.f32.mxu1 %v1000_v54 }
 0x222   : > { %v502_v30 = vpop.f32.mrb[0].mxu1 }
 0x223   : > { %v503_v31 = vadd.f32 %v502_v30, %v410_v29  ;;  %v504_v32 = vpop.f32.mrb[1].mxu1 }
 0x224   : > { %v505_v34 = vadd.f32 %v504_v32, %v410_v29 }
 0x225   : > { %919 = vtanh.f32 %v503_v31 }
 0x226   : > { %v508_v35 = vpop.f32.mrb[2].mxu1  ;;  %921 = vtanh.f32 %v505_v34 }
 0x227   : > { %v509_v36 = vadd.f32 %v508_v35, %v415_v33  ;;  %v510_v37 = vpop.f32.mrb[3].mxu1 }
 0x228   : > { %v511_v38 = vadd.f32 %v510_v37, %v415_v33 }
 0x229   : > { %923 = vtanh.f32 %v509_v36 }
 0x22a   : > { %925 = vtanh.f32 %v511_v38  ;;  %v514_v40 = vpop.f32.mrb[4].mxu1 }
 0x22b   : > { %v515_v41 = vadd.f32 %v514_v40, %v420_v39  ;;  %v516_v42 = vpop.f32.mrb[5].mxu1 }
 0x22c   : > { %v517_v43 = vadd.f32 %v516_v42, %v420_v39 }
 0x22d   : > { %927 = vtanh.f32 %v515_v41 }
 0x22e   : > { %v520_v45 = vpop.f32.mrb[6].mxu1  ;;  %929 = vtanh.f32 %v517_v43 }
 0x22f   : > { %v521_v46 = vadd.f32 %v520_v45, %v425_v44  ;;  %v522_v47 = vpop.f32.mrb[7].mxu1  ;;  %v920_v49 = vpop.eup %919 }
 0x230   : > { %v523_v48 = vadd.f32 %v522_v47, %v425_v44  ;;  %v922_v50 = vpop.eup %921 }
 0x231   : > { %931 = vtanh.f32 %v521_v46 }
 0x232   : > { %933 = vtanh.f32 %v523_v48 }
 0x233   : > { %v924_v51 = vpop.eup %923 }
 0x234   : > { %v926_v52 = vpop.eup %925  ;;  %v851_v53 = vpack.c.bf16 %v924_v51, %v920_v49 }
 0x235   : > { %v849_v54 = vpack.c.bf16 %v926_v52, %v922_v50 }
 0x237   : > { %850 = vmatprep.subr.bf16.mxu1 %v849_v54  ;;  %v928_v55 = vpop.eup %927 }
 0x238   : > { %852 = vmatpush1.bf16.msra.mxu1 %v851_v53  ;;  %v930_v56 = vpop.eup %929 }
 0x23b   : > { %v932_v57 = vpop.eup %931 }
 0x23c   : > { %v934_v58 = vpop.eup %933  ;;  %v855_v59 = vpack.c.bf16 %v932_v57, %v928_v55 }
 0x23d   : > { %v853_v61 = vpack.c.bf16 %v934_v58, %v930_v56 }
 0x23f   : > { %854 = vmatprep.subr.bf16.mxu1 %v853_v61 }
 0x240   : > { %856 = vmatpush1.bf16.msra.mxu1 %v855_v59 }
 0x243   : > { %745 = vmatmul.mubr.msk.f32.vlgmr.msra.gmra.mrb[8].mxu1 %vm427_vm2, %v1198_v60 }
 0x316   : > { %v607_v63 = vpop.f32.mrb[8].mxu1 }
 0x317   : > { %v608_v0 = vadd.f32 %v607_v63, %v537_v62  ;;  %v609_v1 = vpop.f32.mrb[9].mxu1 }
 0x318   : > { %v610_v2 = vadd.f32 %v609_v1, %v537_v62 }
 0x31a   : > { %v614_v3 = vcombine.low %v608_v0, %v610_v2 }
 0x31c   : > { %746 = vst.sshfl [vmem:[%s137_s28] sm:$0x33 pattern:$0x76325410] %v614_v3 }
 0x31d   : > { %948 = shalt.err (!%p945_p3)
}
 0x31e   : > { %s949_s14 = scalar_lea.hbm %s1216_s4, 64  ;;  %s953_s21 = scalar_lea.hbm %s1260_s2, 128 }
 0x31f   : > { %p950_p4 = scmp.ne.s32.totalorder %s1216_s4, %s949_s14  ;;  %p954_p9 = scmp.lt.u32.totalorder %s1216_s4, %s1260_s2 }
 0x320   : > { %p955_p10 = scmp.lt.u32.totalorder %s953_s21, %s949_s14  ;;  %p957_p12 = scmp.lt.u32.totalorder %s949_s14, %s1216_s4 }
 0x321   : > { %p951_p7 = pnand %p950_p4, %p1056_p5 }
 0x322   : > { %p956_p11 = por %p955_p10, %p954_p9 }
 0x323   : > { %p952_p8 = pneg %p951_p7 }
 0x324   : > { %p958_p13 = por %p957_p12, %p956_p11 }
 0x326   : > { %p959_p0 = pnand %p958_p13, %p952_p8 }
 0x328   : > { %962 = shalt.err (!%p959_p0)
}
 0x329   : > { %857 = dma.vmem_to_hbm [thread:$0]  (%p1056_p5), %s1218_s29, 64, %s1216_s4, %s625_s5  }
 0x32a PF: > { %p863_p1 = scmp.ge.s32.totalorder %s997_s12, 2  ;;  %s651_s24 = sand.u32 1, %s985_s9  }
 0x32b   : > { %s652_s25 = scalar_lea.sflag [#allocation3], %s651_s24 }
 0x32c   : > { %p860_p2 = pnand %p863_p1, %p1060_p6 }
 0x32e   : > { %980 = dma.done.wait (!%p860_p2), %s652_s25, 64  }
 0x32f   : > { %982 = vsyncadd (!%p860_p2), %s652_s25, 4294967232  ;;  %p12_p3 = scmp.ge.s32.totalorder %s1043_s15, 4   ;;  %s1265_s9 = smov %s989_s10 }
 0x330   : > { %s1266_s10 = smov %s993_s11  ;;  %s1267_s11 = smov %s1054_s18 }
 0x331   : > { %s1268_s12 = smov %s1043_s15  ;;  %14 = sbr.rel (!%p12_p3) target bundleno = 3 (0x3), region = 63 }
 0x338   :  { %657 = vsyncpa [#allocation3], 1 }
 0x339   :  { %659 = vsyncpa [#allocation3 + $0x1], 1 }

// kernel: tpu_custom_call.1
= control target key start
LH: loop header
LB: loop body
LE: loop exit
PB: predicated region body
PF: predicated region fallthrough
CT: control target
= control target key end

     0   :  { %7 = vsyncpa [#allocation3], 0  ;;  %s1258_s0 = inlined_call_operand.vmem [shape: f32[512,4], index: 0, kind: input, shape index: {}]   ;;  %s1259_s1 = inlined_call_operand.vmem [shape: f32[72,128], index: 1, kind: input, shape index: {}]   ;;  %s1260_s2 = inlined_call_operand.hbm [shape: f32[2,512], index: 2, kind: output, shape index: {}]  }
   0x1   :  { %9 = vsyncpa [#allocation3 + $0x1], 0  ;;  %s1018_s9 = smov 0   ;;  %s1020_s10 = smov 0  }
   0x2   :  { %s1022_s11 = smov 0   ;;  %s1024_s12 = smov 0  }
   0x3 LB: > { %s1039_s13 = sadd.s32 4294967295, %s997_s12   ;;  %s698_s14 = sadd.s32 4294967294, %s997_s12   ;;  %s997_s12 = sphi %s1024_s12, %s1268_s12   ;;  %s993_s11 = sphi %s1022_s11, %s1267_s11   ;;  %s989_s10 = sphi %s1020_s10, %s1266_s10   ;;  %s985_s9 = sphi %s1018_s9, %s1265_s9  }
   0x4   : > { %s1043_s15 = sadd.s32 1, %s997_s12   ;;  %s69_s16 = sadd.s32 1, %s993_s11 }
   0x5   : > { %s66_s17 = ssub.s32 %s997_s12, %s1043_s15  ;;  %p79_p0 = scmp.ne.s32.totalorder %s993_s11, %s989_s10 }
   0x6   : > { %p67_p1 = scmp.eq.s32.totalorder %s66_s17, 0  ;;  %p80_p2 = scmp.eq.s32.totalorder %s1039_s13, 1 }
   0x7   : > { %p85_p3 = scmp.ne.s32.totalorder %s989_s10, %s985_s9  ;;  %p86_p4 = scmp.eq.s32.totalorder %s698_s14, 1 }
   0x8   : > { %s1054_s18 = scalar_select %p67_p1, %s993_s11, %s69_s16  }
   0x9   : > { %p1056_p5 = por %p80_p2, %p79_p0  ;;  %p1060_p6 = por %p86_p4, %p85_p3 }
   0xa   : > { %p701_p7 = scmp.ge.s32.totalorder %s997_s12, 1  ;;  %p116_p8 = scmp.lt.s32.totalorder %s997_s12, 3 }
   0xc   : > { %p117_p9 = pnand %p701_p7, %p116_p8 }
   0xd   : > { %s703_s21 = sshll.u32 (!%p117_p9), %s1039_s13, 5  ;;  %vm201_vm0 = vcmask (!%p117_p9), 31744   ;;  %v1070_v0 = vld [vmem:[%s1259_s1] sm:$0xff] (!%p117_p9)  ;;  %v999_v1 = vmov (!%p117_p9), 4   ;;  %v1077_v2 = vld [vmem:[%s1259_s1 + $0x10] sm:$0xff] (!%p117_p9)  ;;  %v1084_v3 = vld [vmem:[%s1259_s1 + $0x8] sm:$0xff] (!%p117_p9) }
   0xe   : > { %120 = sbr.rel (%p117_p9) target bundleno = 810 (0x32a), region = 28  ;;  %p139_p10 = scmp.lt.s32.totalorder (!%p117_p9), %s703_s21, 63  ;;  %785 = vmatprep.mubr.msk.f32.mxu0 (!%p117_p9), %vm201_vm0, %v1070_v0  ;;  %899 = vset.pattern.permute.xlu0 (!%p117_p9), %v999_v1  ;;  %vm1093_vm1 = vmpackc.low (!%p117_p9), %vm201_vm0, %vm201_vm0  ;;  %v1100_v5 = vld [vmem:[%s1259_s1 + $0x18] sm:$0xff] (!%p117_p9)  ;;  %v1000_v54 = vmov (!%p117_p9), 0.0   ;;  %v403_v55 = vld [vmem:[%s1259_s1 + $0x20] sm:$0xff] (!%p117_p9)  ;;  %v1001_v57 = vmov (!%p117_p9), 32  }
   0xf   : > { %183 = vperm.xlu0 (!%p117_p9), %899, %v1070_v0   ;;  %900 = vset.pattern.permute.xlu1 (!%p117_p9), %v999_v1  ;;  %v404_v56 = vld [vmem:[%s1259_s1 + $0x28] sm:$0xff] (!%p117_p9)  ;;  %v405_v58 = vld [vmem:[%s1259_s1 + $0x30] sm:$0xff] (!%p117_p9)  ;;  %v406_v59 = vld [vmem:[%s1259_s1 + $0x38] sm:$0xff] (!%p117_p9)  ;;  %vm427_vm2 = vcmask (!%p117_p9), 261120   ;;  %s135_s25 = sand.u32 (!%p117_p9), 1, %s989_s10   ;;  %s752_s27 = sshll.u32 (!%p117_p9), %s1039_s13, 6 }
  0x10   : > { %193 = vperm.xlu1 (!%p117_p9), %900, %v1077_v2   ;;  %500 = vmatprep.mubr.f32.mxu1 (!%p117_p9), %v1000_v54  ;;  %v1198_v60 = vld [vmem:[%s1259_s1 + $0x40] sm:$0x3] (!%p117_p9)  ;;  %s1216_s4 = scalar_lea.hbm (!%p117_p9), %s1260_s2, %s752_s27  ;;  %s625_s5 = scalar_lea.sflag (!%p117_p9), [#allocation3], %s135_s25 }
  0x11   : > { %s1002_s13 = smov (!%p117_p9), [#allocation2]  }
  0x12   : > { %s939_s7 = sshll.u32 (!%p117_p9), %s1002_s13, 4  ;;  %s940_s7 = int_to_ptr.vmem [resolvable:$false] %s939_s7 }
  0x13   : > { %188 = vperm.xlu0 (!%p117_p9), %899, %v1084_v3   ;;  %s941_s8 = scalar_lea.vmem (!%p117_p9), %s940_s7, 128 }
  0x14   : > { %198 = vperm.xlu1 (!%p117_p9), %900, %v1100_v5  }
  0x15   : > { %s1270_s21 = smov (!%p139_p10, %s703_s21), 63 }
  0x16   : > { %s704_s26 = sshll.u32 %s1270_s21, 3 }
  0x17   : > { %s1089_s3 = scalar_lea.vmem %s1258_s0, %s704_s26  ;;  %901 = vset.pattern.permute.xlu0 %v1001_v57  ;;  %s702_s26 = sshll.u32 %s135_s25, 2 }
  0x18   : > { %v161_v6 = vld [vmem:[%s1089_s3 + $0x80] sm:$0xff]  ;;  %v162_v7 = vld [vmem:[%s1089_s3 + $0x88] sm:$0xff]  ;;  %v163_v11 = vld [vmem:[%s1089_s3 + $0x90] sm:$0xff]  ;;  %902 = vset.pattern.permute.xlu1 %v1001_v57  ;;  %409 = vperm.xlu0 %901, %v403_v55   ;;  %s137_s28 = scalar_lea.vmem [#allocation2], %s702_s26 }
  0x19   : > { %v145_v8 = vld [vmem:[%s1089_s3] sm:$0xff]  ;;  %v793_v9 = vpack.c.bf16 %v162_v7, %v161_v6  ;;  %v146_v10 = vld [vmem:[%s1089_s3 + $0x8] sm:$0xff]  ;;  %v164_v12 = vld [vmem:[%s1089_s3 + $0x98] sm:$0xff]  ;;  %414 = vperm.xlu1 %902, %v404_v56   ;;  %s639_s29 = sshll.u32 %s137_s28, 4  ;;  %s1218_s29 = int_to_ptr.vmem [resolvable:$true] %s639_s29 }
  0x1a   : > { %v796_v13 = vpack.c.bf16 %v146_v10, %v145_v8  ;;  %v799_v14 = vpack.c.bf16 %v164_v12, %v163_v11  ;;  %v147_v15 = vld [vmem:[%s1089_s3 + $0x10] sm:$0xff]  ;;  %v148_v16 = vld [vmem:[%s1089_s3 + $0x18] sm:$0xff]  ;;  %v165_v17 = vld [vmem:[%s1089_s3 + $0xa0] sm:$0xff]  ;;  %s935_s6 = scalar_lea.vmem %s1218_s29, 64  ;;  %p942_p0 = scmp.lt.s32.totalorder %s1218_s29, %s940_s7 }
  0x1b   : > { %795 = vmatprep.subr.msk.bf16.mxu0 %vm1093_vm1, %v793_v9  ;;  %v166_v18 = vld [vmem:[%s1089_s3 + $0xa8] sm:$0xff]  ;;  %v802_v19 = vpack.c.bf16 %v148_v16, %v147_v15  ;;  %v149_v21 = vld [vmem:[%s1089_s3 + $0x20] sm:$0xff]  ;;  %v167_v23 = vld [vmem:[%s1089_s3 + $0xb0] sm:$0xff]  ;;  %p936_p11 = scmp.ne.s32.totalorder %s1218_s29, %s935_s6  ;;  %p943_p1 = scmp.lt.s32.totalorder %s941_s8, %s935_s6 }
  0x1c   : > { %798 = vmatpush3.bf16.xpose.msk.msra.mxu0 %vm1093_vm1, %v796_v13  ;;  %v805_v20 = vpack.c.bf16 %v166_v18, %v165_v17  ;;  %v150_v22 = vld [vmem:[%s1089_s3 + $0x28] sm:$0xff]  ;;  %v168_v24 = vld [vmem:[%s1089_s3 + $0xb8] sm:$0xff]  ;;  %v151_v27 = vld [vmem:[%s1089_s3 + $0x30] sm:$0xff]  ;;  %424 = vperm.xlu0 %901, %v406_v59  }
  0x1d   : > { %801 = vmatprep.subr.msk.bf16.mxu0 %vm1093_vm1, %v799_v14  ;;  %v808_v25 = vpack.c.bf16 %v150_v22, %v149_v21  ;;  %v811_v26 = vpack.c.bf16 %v168_v24, %v167_v23  ;;  %v152_v28 = vld [vmem:[%s1089_s3 + $0x38] sm:$0xff]  ;;  %v169_v29 = vld [vmem:[%s1089_s3 + $0xc0] sm:$0xff]  ;;  %v170_v30 = vld [vmem:[%s1089_s3 + $0xc8] sm:$0xff]  ;;  %419 = vperm.xlu1 %902, %v405_v58   ;;  %p937_p12 = pnand %p936_p11, %p1056_p5  ;;  %p944_p2 = por %p943_p1, %p942_p0 }
  0x1e   : > { %v814_v31 = vpack.c.bf16 %v152_v28, %v151_v27  ;;  %v817_v32 = vpack.c.bf16 %v170_v30, %v169_v29  ;;  %v153_v33 = vld [vmem:[%s1089_s3 + $0x40] sm:$0xff]  ;;  %v154_v34 = vld [vmem:[%s1089_s3 + $0x48] sm:$0xff]  ;;  %v171_v35 = vld [vmem:[%s1089_s3 + $0xd0] sm:$0xff] }
  0x1f   : > { %v172_v36 = vld [vmem:[%s1089_s3 + $0xd8] sm:$0xff]  ;;  %v820_v37 = vpack.c.bf16 %v154_v34, %v153_v33  ;;  %v155_v39 = vld [vmem:[%s1089_s3 + $0x50] sm:$0xff]  ;;  %v173_v41 = vld [vmem:[%s1089_s3 + $0xe0] sm:$0xff]  ;;  %p938_p13 = pneg %p937_p12 }
  0x20   : > { %v823_v38 = vpack.c.bf16 %v172_v36, %v171_v35  ;;  %v156_v40 = vld [vmem:[%s1089_s3 + $0x58] sm:$0xff]  ;;  %v174_v42 = vld [vmem:[%s1089_s3 + $0xe8] sm:$0xff]  ;;  %v157_v45 = vld [vmem:[%s1089_s3 + $0x60] sm:$0xff] }
  0x21   : > { %v826_v43 = vpack.c.bf16 %v156_v40, %v155_v39  ;;  %v829_v44 = vpack.c.bf16 %v174_v42, %v173_v41  ;;  %v158_v46 = vld [vmem:[%s1089_s3 + $0x68] sm:$0xff]  ;;  %v175_v47 = vld [vmem:[%s1089_s3 + $0xf0] sm:$0xff]  ;;  %v176_v48 = vld [vmem:[%s1089_s3 + $0xf8] sm:$0xff]  ;;  %536 = vperm.xlu1 %902, %v1198_v60   ;;  %p945_p3 = pnand %p944_p2, %p938_p13 }
  0x22   : > { %v832_v49 = vpack.c.bf16 %v158_v46, %v157_v45  ;;  %v835_v50 = vpack.c.bf16 %v176_v48, %v175_v47  ;;  %v159_v51 = vld [vmem:[%s1089_s3 + $0x70] sm:$0xff]  ;;  %v160_v52 = vld [vmem:[%s1089_s3 + $0x78] sm:$0xff] }
  0x23   : > { %v838_v53 = vpack.c.bf16 %v160_v52, %v159_v51 }
  0x24   : > { %804 = vmatpush3.bf16.xpose.msk.msra.mxu0 %vm1093_vm1, %v802_v19 }
  0x25   : > { %807 = vmatprep.subr.msk.bf16.mxu0 %vm1093_vm1, %v805_v20 }
  0x2c   : > { %810 = vmatpush3.bf16.xpose.msk.msra.mxu0 %vm1093_vm1, %v808_v25 }
  0x2d   : > { %813 = vmatprep.subr.msk.bf16.mxu0 %vm1093_vm1, %v811_v26 }
  0x34   : > { %816 = vmatpush3.bf16.xpose.msk.msra.mxu0 %vm1093_vm1, %v814_v31 }
  0x35   : > { %819 = vmatprep.subr.msk.bf16.mxu0 %vm1093_vm1, %v817_v32 }
  0x3c   : > { %822 = vmatpush3.bf16.xpose.msk.msra.mxu0 %vm1093_vm1, %v820_v37 }
  0x3d   : > { %825 = vmatprep.subr.msk.bf16.mxu0 %vm1093_vm1, %v823_v38 }
  0x44   : > { %828 = vmatpush3.bf16.xpose.msk.msra.mxu0 %vm1093_vm1, %v826_v43 }
  0x45   : > { %831 = vmatprep.subr.msk.bf16.mxu0 %vm1093_vm1, %v829_v44 }
  0x4c   : > { %834 = vmatpush3.bf16.xpose.msk.msra.mxu0 %vm1093_vm1, %v832_v49 }
  0x4d   : > { %837 = vmatprep.subr.msk.bf16.mxu0 %vm1093_vm1, %v835_v50 }
  0x54   : > { %840 = vmatpush3.bf16.xpose.msk.msra.mxu0 %vm1093_vm1, %v838_v53 }
  0x5b   : > { %786 = vmatmul.mubr.msk.f32.vlgmr.msra.gmra.mrb[0].mxu0 %vm201_vm0, %v1070_v0 }
  0x5c   : > { %787 = vmatprep.mubr.msk.f32.mxu0 %vm201_vm0, %v1084_v3 }
  0x5f   : > { %788 = vmatmul.mubr.msk.f32.gmra.mrb[2].mxu0 %vm201_vm0, %v1084_v3 }
  0x60   : > { %789 = vmatprep.mubr.msk.f32.mxu0 %vm201_vm0, %v1077_v2 }
  0x63   : > { %790 = vmatmul.mubr.msk.f32.gmra.mrb[4].mxu0 %vm201_vm0, %v1077_v2 }
  0x64   : > { %791 = vmatprep.mubr.msk.f32.mxu0 %vm201_vm0, %v1100_v5 }
  0x67   : > { %792 = vmatmul.mubr.msk.f32.gmra.mrb[6].mxu0 %vm201_vm0, %v1100_v5 }
  0x8e   : > { %v184_v61 = vpop.permute.xlu0 %183 }
  0x8f   : > { %v194_v6 = vpop.permute.xlu1 %193 }
  0x92   : > { %v189_v2 = vpop.permute.xlu0 %188 }
  0x93   : > { %v199_v12 = vpop.permute.xlu1 %198 }
  0x97   : > { %v410_v29 = vpop.permute.xlu0 %409 }
  0x98   : > { %v415_v33 = vpop.permute.xlu1 %414 }
  0x9b   : > { %v425_v44 = vpop.permute.xlu0 %424 }
  0x9c   : > { %v420_v39 = vpop.permute.xlu1 %419 }
 0x12e   : > { %v372_v62 = vpop.f32.mrb[0].mxu0 }
 0x12f   : > { %v373_v63 = vadd.f32 %v372_v62, %v184_v61  ;;  %v374_v0 = vpop.f32.mrb[1].mxu0  ;;  %v537_v62 = vpop.permute.xlu1 %536 }
 0x130   : > { %v375_v1 = vadd.f32 %v374_v0, %v184_v61 }
 0x131   : > { %903 = vtanh.f32 %v373_v63 }
 0x132   : > { %v378_v3 = vpop.f32.mrb[2].mxu0  ;;  %905 = vtanh.f32 %v375_v1 }
 0x133   : > { %v379_v4 = vadd.f32 %v378_v3, %v189_v2  ;;  %v380_v5 = vpop.f32.mrb[3].mxu0 }
 0x134   : > { %v381_v7 = vadd.f32 %v380_v5, %v189_v2 }
 0x135   : > { %907 = vtanh.f32 %v379_v4 }
 0x136   : > { %909 = vtanh.f32 %v381_v7  ;;  %v384_v8 = vpop.f32.mrb[4].mxu0 }
 0x137   : > { %v385_v9 = vadd.f32 %v384_v8, %v194_v6  ;;  %v386_v10 = vpop.f32.mrb[5].mxu0 }
 0x138   : > { %v387_v11 = vadd.f32 %v386_v10, %v194_v6 }
 0x139   : > { %911 = vtanh.f32 %v385_v9 }
 0x13a   : > { %v390_v13 = vpop.f32.mrb[6].mxu0  ;;  %913 = vtanh.f32 %v387_v11 }
 0x13b   : > { %v391_v14 = vadd.f32 %v390_v13, %v199_v12  ;;  %v392_v15 = vpop.f32.mrb[7].mxu0  ;;  %v904_v17 = vpop.eup %903 }
 0x13c   : > { %v393_v16 = vadd.f32 %v392_v15, %v199_v12  ;;  %v906_v18 = vpop.eup %905 }
 0x13d   : > { %915 = vtanh.f32 %v391_v14 }
 0x13e   : > { %917 = vtanh.f32 %v393_v16 }
 0x13f   : > { %v908_v19 = vpop.eup %907 }
 0x140   : > { %v910_v20 = vpop.eup %909  ;;  %v843_v21 = vpack.c.bf16 %v908_v19, %v904_v17 }
 0x141   : > { %v841_v22 = vpack.c.bf16 %v910_v20, %v906_v18 }
 0x143   : > { %842 = vmatprep.subr.bf16.mxu1 %v841_v22  ;;  %v912_v23 = vpop.eup %911 }
 0x144   : > { %844 = vmatpush1.bf16.msra.mxu1 %v843_v21  ;;  %v914_v24 = vpop.eup %913 }
 0x147   : > { %v916_v25 = vpop.eup %915 }
 0x148   : > { %v918_v26 = vpop.eup %917  ;;  %v847_v27 = vpack.c.bf16 %v916_v25, %v912_v23 }
 0x149   : > { %v845_v28 = vpack.c.bf16 %v918_v26, %v914_v24 }
 0x14b   : > { %846 = vmatprep.subr.bf16.mxu1 %v845_v28 }
 0x14c   : > { %848 = vmatpush1.bf16.msra.mxu1 %v847_v27 }
 0x14f   : > { %741 = vmatmul.mubr.msk.f32.vlgmr.msra.gmra.mrb[0].mxu1 %vm427_vm2, %v403_v55 }
 0x150   : > { %506 = vmatprep.mubr.f32.mxu1 %v1000_v54 }
 0x153   : > { %742 = vmatmul.mubr.msk.f32.gmra.mrb[2].mxu1 %vm427_vm2, %v404_v56 }
 0x154   : > { %512 = vmatprep.mubr.f32.mxu1 %v1000_v54 }
 0x157   : > { %743 = vmatmul.mubr.msk.f32.gmra.mrb[4].mxu1 %vm427_vm2, %v405_v58 }
 0x158   : > { %518 = vmatprep.mubr.f32.mxu1 %v1000_v54 }
 0x15b   : > { %744 = vmatmul.mubr.msk.f32.gmra.mrb[6].mxu1 %vm427_vm2, %v406_v59 }
 0x15c   : > { %605 = vmatprep.mubr.f32.mxu1 %v1000_v54 }
 0x222   : > { %v502_v30 = vpop.f32.mrb[0].mxu1 }
 0x223   : > { %v503_v31 = vadd.f32 %v502_v30, %v410_v29  ;;  %v504_v32 = vpop.f32.mrb[1].mxu1 }
 0x224   : > { %v505_v34 = vadd.f32 %v504_v32, %v410_v29 }
 0x225   : > { %919 = vtanh.f32 %v503_v31 }
 0x226   : > { %v508_v35 = vpop.f32.mrb[2].mxu1  ;;  %921 = vtanh.f32 %v505_v34 }
 0x227   : > { %v509_v36 = vadd.f32 %v508_v35, %v415_v33  ;;  %v510_v37 = vpop.f32.mrb[3].mxu1 }
 0x228   : > { %v511_v38 = vadd.f32 %v510_v37, %v415_v33 }
 0x229   : > { %923 = vtanh.f32 %v509_v36 }
 0x22a   : > { %925 = vtanh.f32 %v511_v38  ;;  %v514_v40 = vpop.f32.mrb[4].mxu1 }
 0x22b   : > { %v515_v41 = vadd.f32 %v514_v40, %v420_v39  ;;  %v516_v42 = vpop.f32.mrb[5].mxu1 }
 0x22c   : > { %v517_v43 = vadd.f32 %v516_v42, %v420_v39 }
 0x22d   : > { %927 = vtanh.f32 %v515_v41 }
 0x22e   : > { %v520_v45 = vpop.f32.mrb[6].mxu1  ;;  %929 = vtanh.f32 %v517_v43 }
 0x22f   : > { %v521_v46 = vadd.f32 %v520_v45, %v425_v44  ;;  %v522_v47 = vpop.f32.mrb[7].mxu1  ;;  %v920_v49 = vpop.eup %919 }
 0x230   : > { %v523_v48 = vadd.f32 %v522_v47, %v425_v44  ;;  %v922_v50 = vpop.eup %921 }
 0x231   : > { %931 = vtanh.f32 %v521_v46 }
 0x232   : > { %933 = vtanh.f32 %v523_v48 }
 0x233   : > { %v924_v51 = vpop.eup %923 }
 0x234   : > { %v926_v52 = vpop.eup %925  ;;  %v851_v53 = vpack.c.bf16 %v924_v51, %v920_v49 }
 0x235   : > { %v849_v54 = vpack.c.bf16 %v926_v52, %v922_v50 }
 0x237   : > { %850 = vmatprep.subr.bf16.mxu1 %v849_v54  ;;  %v928_v55 = vpop.eup %927 }
 0x238   : > { %852 = vmatpush1.bf16.msra.mxu1 %v851_v53  ;;  %v930_v56 = vpop.eup %929 }
 0x23b   : > { %v932_v57 = vpop.eup %931 }
 0x23c   : > { %v934_v58 = vpop.eup %933  ;;  %v855_v59 = vpack.c.bf16 %v932_v57, %v928_v55 }
 0x23d   : > { %v853_v61 = vpack.c.bf16 %v934_v58, %v930_v56 }
 0x23f   : > { %854 = vmatprep.subr.bf16.mxu1 %v853_v61 }
 0x240   : > { %856 = vmatpush1.bf16.msra.mxu1 %v855_v59 }
 0x243   : > { %745 = vmatmul.mubr.msk.f32.vlgmr.msra.gmra.mrb[8].mxu1 %vm427_vm2, %v1198_v60 }
 0x316   : > { %v607_v63 = vpop.f32.mrb[8].mxu1 }
 0x317   : > { %v608_v0 = vadd.f32 %v607_v63, %v537_v62  ;;  %v609_v1 = vpop.f32.mrb[9].mxu1 }
 0x318   : > { %v610_v2 = vadd.f32 %v609_v1, %v537_v62 }
 0x31a   : > { %v614_v3 = vcombine.low %v608_v0, %v610_v2 }
 0x31c   : > { %746 = vst.sshfl [vmem:[%s137_s28] sm:$0x33 pattern:$0x76325410] %v614_v3 }
 0x31d   : > { %948 = shalt.err (!%p945_p3)
}
 0x31e   : > { %s949_s14 = scalar_lea.hbm %s1216_s4, 64  ;;  %s953_s21 = scalar_lea.hbm %s1260_s2, 128 }
 0x31f   : > { %p950_p4 = scmp.ne.s32.totalorder %s1216_s4, %s949_s14  ;;  %p954_p9 = scmp.lt.u32.totalorder %s1216_s4, %s1260_s2 }
 0x320   : > { %p955_p10 = scmp.lt.u32.totalorder %s953_s21, %s949_s14  ;;  %p957_p12 = scmp.lt.u32.totalorder %s949_s14, %s1216_s4 }
 0x321   : > { %p951_p7 = pnand %p950_p4, %p1056_p5 }
 0x322   : > { %p956_p11 = por %p955_p10, %p954_p9 }
 0x323   : > { %p952_p8 = pneg %p951_p7 }
 0x324   : > { %p958_p13 = por %p957_p12, %p956_p11 }
 0x326   : > { %p959_p0 = pnand %p958_p13, %p952_p8 }
 0x328   : > { %962 = shalt.err (!%p959_p0)
}
 0x329   : > { %857 = dma.vmem_to_hbm [thread:$0]  (%p1056_p5), %s1218_s29, 64, %s1216_s4, %s625_s5  }
 0x32a PF: > { %p863_p1 = scmp.ge.s32.totalorder %s997_s12, 2  ;;  %s651_s24 = sand.u32 1, %s985_s9  }
 0x32b   : > { %s652_s25 = scalar_lea.sflag [#allocation3], %s651_s24 }
 0x32c   : > { %p860_p2 = pnand %p863_p1, %p1060_p6 }
 0x32e   : > { %980 = dma.done.wait (!%p860_p2), %s652_s25, 64  }
 0x32f   : > { %982 = vsyncadd (!%p860_p2), %s652_s25, 4294967232  ;;  %p12_p3 = scmp.ge.s32.totalorder %s1043_s15, 4   ;;  %s1265_s9 = smov %s989_s10 }
 0x330   : > { %s1266_s10 = smov %s993_s11  ;;  %s1267_s11 = smov %s1054_s18 }
 0x331   : > { %s1268_s12 = smov %s1043_s15  ;;  %14 = sbr.rel (!%p12_p3) target bundleno = 3 (0x3), region = 63 }
 0x338   :  { %657 = vsyncpa [#allocation3], 1 }
 0x339   :  { %659 = vsyncpa [#allocation3 + $0x1], 1 }

</bundles_post_ra>
